<compile_context>
chip_gen: v5e
topology: v5e:2x2
jax: 0.10.0
libtpu: 0.0.40
codegen_flags: <defaults>
</compile_context>

<pallas_src>
import functools

import numpy as np
import jax
import jax.numpy as jnp
from jax import lax
from jax.experimental import pallas as pl
from jax.experimental.pallas import tpu as pltpu

NUM_SEM = 10       # stand-in for Tree.num_sem
GN_EPS = 1e-5      # torch.nn.GroupNorm default eps
LANE = 128


def _encoder_kernel(x_ref, w_cs_ref, b_cs_ref, w_second_ref, b_second_ref,
                    mask_ref, mask_t_ref, gamma_ref, beta_ref, o_ref,
                    *, symmetric_type, num_groups, hidden_size, feature_size):
    Fh, Ff = hidden_size, feature_size
    w_cs = w_cs_ref[...]                              # [Dp, Fh+Ff]  (child | skip)
    b_cs = b_cs_ref[...]                              # [1,  Fh+Ff]

    if symmetric_type == 'max':
        x = x_ref[...]                                # [TB, M, Dp]
        TB, M, Dp = x.shape
        cs = jnp.dot(x.reshape(TB * M, Dp), w_cs,
                     preferred_element_type=jnp.float32).reshape(TB, M, Fh + Ff)
        # bias is constant over children -> exact to add after the max
        red = jnp.max(cs, axis=1) + b_cs              # [TB, Fh+Ff]
    elif symmetric_type == 'sum':
        M = x_ref.shape[1]
        x_red = jnp.sum(x_ref[...], axis=1)           # [TB, Dp]
        red = jnp.dot(x_red, w_cs,
                      preferred_element_type=jnp.float32) + M * b_cs
    elif symmetric_type == 'avg':
        M = x_ref.shape[1]
        x_red = jnp.sum(x_ref[...], axis=1) * (1.0 / M)
        red = jnp.dot(x_red, w_cs,
                      preferred_element_type=jnp.float32) + b_cs
    else:
        raise ValueError(f'Unknown symmetric type: {symmetric_type}')

    red = jnp.maximum(red, 0.0)                       # ReLU on both fused halves
    parent = red[:, :Fh]                              # child_op half -> hidden
    skip_feat = red[:, Fh:Fh + Ff]                    # skip_op  half -> feature

    # --- second Linear: [TB, Fh] @ [Fh, Ff] ---
    y = jnp.dot(parent, w_second_ref[...],
                preferred_element_type=jnp.float32) + b_second_ref[...]   # [TB, Ff]
    TB = y.shape[0]

    # --- GroupNorm via two fused mask-matmuls (masks are static inputs) ---
    g = Ff // num_groups
    yy = jnp.concatenate([y, y * y], axis=0)                              # [2TB, Ff]
    st = jnp.dot(yy, mask_ref[...],
                 preferred_element_type=jnp.float32) * (1.0 / g)          # [2TB, G]
    mean_g = st[:TB]
    var_g = st[TB:] - mean_g * mean_g                 # biased variance (torch GroupNorm)
    mv = jnp.dot(jnp.concatenate([mean_g, var_g], axis=0), mask_t_ref[...],
                 preferred_element_type=jnp.float32)                      # [2TB, Ff]
    gn = (y - mv[:TB]) * lax.rsqrt(mv[TB:] + GN_EPS) * gamma_ref[...] + beta_ref[...]

    # --- skip connection + final ReLU ---
    o_ref[...] = jnp.maximum(skip_feat + gn, 0.0)


def symmetric_child_diff_encoder(x, params, *, symmetric_type, num_groups,
                                 row_tile=128):
    B, M, D = x.shape
    Fh = params['w_child'].shape[1]
    Ff = params['w_skip'].shape[1]
    Dp = pl.cdiv(D, LANE) * LANE

    # --- host-side prep (fuses into the surrounding jit) ---
    w_cs = jnp.concatenate([params['w_child'], params['w_skip']], axis=1)   # [D, Fh+Ff]
    w_cs = jnp.pad(w_cs, ((0, Dp - D), (0, 0)))                             # K -> 128
    b_cs = jnp.concatenate([params['b_child'], params['b_skip']], axis=1)   # [1, Fh+Ff]
    xp = jnp.pad(x, ((0, 0), (0, 0), (0, Dp - D)))                          # lane-align D

    g = Ff // num_groups
    mask_np = (np.arange(Ff)[:, None] // g ==
               np.arange(num_groups)[None, :]).astype(np.float32)
    mask = jnp.asarray(mask_np)            # [Ff, G]
    mask_t = jnp.asarray(mask_np.T)        # [G, Ff]

    kernel = functools.partial(_encoder_kernel,
                               symmetric_type=symmetric_type,
                               num_groups=num_groups,
                               hidden_size=Fh, feature_size=Ff)

    if B <= row_tile:
        # Single-shot path: no grid, no pipeline machinery; everything resident in VMEM.
        vmem = pl.BlockSpec(memory_space=pltpu.MemorySpace.VMEM)
        operands = (xp, w_cs, b_cs, params['w_second'], params['b_second'],
                    mask, mask_t, params['gamma'], params['beta'])
        return pl.pallas_call(
            kernel,
            out_shape=jax.ShapeDtypeStruct((B, Ff), jnp.float32),
            in_specs=[vmem] * len(operands),
            out_specs=vmem,
        )(*operands)

    # Batched path: many tree nodes per call, row-tiled over a parallel grid axis
    # (both TensorCores on v7x split it); weights stay resident via constant maps.
    Bp = pl.cdiv(B, row_tile) * row_tile
    if Bp != B:
        xp = jnp.pad(xp, ((0, Bp - B), (0, 0), (0, 0)))
    n_tiles = Bp // row_tile

    def const(shape):
        return pl.BlockSpec(shape, lambda i, _s=len(shape): (0,) * _s)

    out = pl.pallas_call(
        kernel,
        out_shape=jax.ShapeDtypeStruct((Bp, Ff), jnp.float32),
        grid=(n_tiles,),
        in_specs=[
            pl.BlockSpec((row_tile, M, Dp), lambda i: (i, 0, 0)),   # x tiles
            const((Dp, Fh + Ff)), const((1, Fh + Ff)),              # fused child|skip W, b
            const((Fh, Ff)), const((1, Ff)),                        # second W, b
            const((Ff, num_groups)), const((num_groups, Ff)),       # GN group masks
            const((1, Ff)), const((1, Ff)),                         # GN gamma, beta
        ],
        out_specs=pl.BlockSpec((row_tile, Ff), lambda i: (i, 0)),
        compiler_params=pltpu.CompilerParams(dimension_semantics=("parallel",)),
    )(xp, w_cs, b_cs, params['w_second'], params['b_second'],
      mask, mask_t, params['gamma'], params['beta'])
    return out[:B]


def _reference(x, p, symmetric_type, num_groups):
    """Pure-JAX reference matching the PyTorch module semantics."""
    skip = x @ p['w_skip'] + p['b_skip'][0]
    child = x @ p['w_child'] + p['b_child'][0]
    if symmetric_type == 'max':
        parent = jax.nn.relu(child.max(axis=1))
        skip_feat = jax.nn.relu(skip.max(axis=1))
    elif symmetric_type == 'sum':
        parent = jax.nn.relu(child.sum(axis=1))
        skip_feat = jax.nn.relu(skip.sum(axis=1))
    else:  # avg
        parent = jax.nn.relu(child.sum(axis=1) / child.shape[1])
        skip_feat = jax.nn.relu(skip.sum(axis=1) / skip.shape[1])
    y = parent @ p['w_second'] + p['b_second'][0]
    B, F = y.shape
    g = F // num_groups
    yg = y.reshape(B, num_groups, g)
    mean = yg.mean(axis=2, keepdims=True)
    var = ((yg - mean) ** 2).mean(axis=2, keepdims=True)   # biased, as in torch
    yn = ((yg - mean) / jnp.sqrt(var + GN_EPS)).reshape(B, F)
    gn = yn * p['gamma'][0] + p['beta'][0]
    return jax.nn.relu(skip_feat + gn)


def _init_params(key, feature_size, hidden_size):
    in_dim = 3 * feature_size + NUM_SEM + 4
    ks = jax.random.split(key, 6)

    def linear(kw, kb, fan_in, fan_out):
        bound = 1.0 / np.sqrt(fan_in)
        w = jax.random.uniform(kw, (fan_in, fan_out), jnp.float32, -bound, bound)
        b = jax.random.uniform(kb, (1, fan_out), jnp.float32, -bound, bound)
        return w, b

    w_child, b_child = linear(ks[0], ks[1], in_dim, hidden_size)
    w_skip, b_skip = linear(ks[2], ks[3], in_dim, feature_size)
    w_second, b_second = linear(ks[4], ks[5], hidden_size, feature_size)
    return {
        'w_child': w_child, 'b_child': b_child,
        'w_skip': w_skip, 'b_skip': b_skip,
        'w_second': w_second, 'b_second': b_second,
        'gamma': jnp.ones((1, feature_size), jnp.float32),   # GroupNorm default init
        'beta': jnp.zeros((1, feature_size), jnp.float32),
    }


if __name__ == "__main__":
    feature_size = 32
    hidden_size = 32
    batch = 2
    max_childs = 8
    num_groups = min(32, feature_size // 8)       # = 4
    in_dim = 3 * feature_size + NUM_SEM + 4       # = 110

    key = jax.random.PRNGKey(0)
    kx, kp, kb = jax.random.split(key, 3)
    x = jax.random.normal(kx, (batch, max_childs, in_dim), jnp.float32)
    params = _init_params(kp, feature_size, hidden_size)

    # Small-shape check for every symmetric mode (gridless single-shot path).
    for st in ('max', 'sum', 'avg'):
        enc = jax.jit(functools.partial(symmetric_child_diff_encoder,
                                        symmetric_type=st, num_groups=num_groups))
        out = jax.block_until_ready(enc(x, params))
        ref = jax.block_until_ready(_reference(x, params, st, num_groups))
        assert out.shape == (batch, feature_size)
        assert np.allclose(np.asarray(out), np.asarray(ref), rtol=1e-4, atol=1e-4), \
            f"Pallas kernel mismatch vs reference (symmetric_type={st})"

    # Batched path: many tree nodes per call, row-tiled parallel grid (exercises row padding).
    big_b = 200
    xb = jax.random.normal(kb, (big_b, max_childs, in_dim), jnp.float32)
    enc_b = jax.jit(functools.partial(symmetric_child_diff_encoder,
                                      symmetric_type='max', num_groups=num_groups))
    outb = jax.block_until_ready(enc_b(xb, params))
    refb = jax.block_until_ready(_reference(xb, params, 'max', num_groups))
    assert outb.shape == (big_b, feature_size)
    assert np.allclose(np.asarray(outb), np.asarray(refb), rtol=1e-4, atol=1e-4), \
        "Pallas kernel mismatch vs reference (batched grid path)"

    print("KERNEL_OK")
</pallas_src>

<mosaic_0001>
module attributes {stable_mosaic.version = 11 : i64} {
  func.func @_encoder_kernel(%arg0: memref<2x8x128xf32, #tpu.memory_space<vmem>>, %arg1: memref<128x64xf32, #tpu.memory_space<vmem>>, %arg2: memref<1x64xf32, #tpu.memory_space<vmem>>, %arg3: memref<32x32xf32, #tpu.memory_space<vmem>>, %arg4: memref<1x32xf32, #tpu.memory_space<vmem>>, %arg5: memref<32x4xf32, #tpu.memory_space<vmem>>, %arg6: memref<4x32xf32, #tpu.memory_space<vmem>>, %arg7: memref<1x32xf32, #tpu.memory_space<vmem>>, %arg8: memref<1x32xf32, #tpu.memory_space<vmem>>, %arg9: memref<2x32xf32, #tpu.memory_space<vmem>>) attributes {dimension_semantics = [], scalar_prefetch = 0 : i64, scratch_operands = 0 : i64, tpu.core_type = #tpu.core_type<tc>} {
    %c0 = arith.constant 0 : index
    %c0_0 = arith.constant 0 : index
    %0 = vector.load %arg1[%c0, %c0_0] : memref<128x64xf32, #tpu.memory_space<vmem>>, vector<128x64xf32>
    %c0_1 = arith.constant 0 : index
    %c0_2 = arith.constant 0 : index
    %1 = vector.load %arg2[%c0_1, %c0_2] : memref<1x64xf32, #tpu.memory_space<vmem>>, vector<1x64xf32>
    %c0_3 = arith.constant 0 : index
    %c0_4 = arith.constant 0 : index
    %c0_5 = arith.constant 0 : index
    %2 = vector.load %arg0[%c0_3, %c0_4, %c0_5] : memref<2x8x128xf32, #tpu.memory_space<vmem>>, vector<2x8x128xf32>
    %3 = vector.shape_cast %2 : vector<2x8x128xf32> to vector<16x128xf32>
    %cst = arith.constant dense<0.000000e+00> : vector<16x64xf32>
    %4 = tpu.matmul %3, %0, %cst {dimension_numbers = #tpu.dot_dimension_numbers<[1], [0], [0], [1], [0, 0, 1, 1], [], []>} : vector<16x128xf32>, vector<128x64xf32>, vector<16x64xf32> -> vector<16x64xf32>
    %5 = vector.shape_cast %4 : vector<16x64xf32> to vector<2x8x64xf32>
    %cst_6 = arith.constant dense<0xFF800000> : vector<2x64xf32>
    %6 = vector.multi_reduction <maximumf>, %5, %cst_6 [1] : vector<2x8x64xf32> to vector<2x64xf32>
    %7 = vector.broadcast %1 : vector<1x64xf32> to vector<2x64xf32>
    %8 = arith.addf %6, %7 : vector<2x64xf32>
    %cst_7 = arith.constant 0.000000e+00 : f32
    %9 = vector.broadcast %cst_7 : f32 to vector<2x64xf32>
    %10 = arith.maximumf %8, %9 : vector<2x64xf32>
    %11 = vector.extract_strided_slice %10 {offsets = [0, 0], sizes = [2, 32], strides = [1, 1]} : vector<2x64xf32> to vector<2x32xf32>
    %12 = vector.extract_strided_slice %10 {offsets = [0, 32], sizes = [2, 32], strides = [1, 1]} : vector<2x64xf32> to vector<2x32xf32>
    %c0_8 = arith.constant 0 : index
    %c0_9 = arith.constant 0 : index
    %13 = vector.load %arg3[%c0_8, %c0_9] : memref<32x32xf32, #tpu.memory_space<vmem>>, vector<32x32xf32>
    %cst_10 = arith.constant dense<0.000000e+00> : vector<2x32xf32>
    %14 = tpu.matmul %11, %13, %cst_10 {dimension_numbers = #tpu.dot_dimension_numbers<[1], [0], [0], [1], [0, 0, 1, 1], [], []>} : vector<2x32xf32>, vector<32x32xf32>, vector<2x32xf32> -> vector<2x32xf32>
    %c0_11 = arith.constant 0 : index
    %c0_12 = arith.constant 0 : index
    %15 = vector.load %arg4[%c0_11, %c0_12] : memref<1x32xf32, #tpu.memory_space<vmem>>, vector<1x32xf32>
    %16 = vector.broadcast %15 : vector<1x32xf32> to vector<2x32xf32>
    %17 = arith.addf %14, %16 : vector<2x32xf32>
    %18 = arith.mulf %17, %17 : vector<2x32xf32>
    %19 = tpu.concatenate %17, %18 in 0 : vector<2x32xf32>, vector<2x32xf32> -> vector<4x32xf32>
    %c0_13 = arith.constant 0 : index
    %c0_14 = arith.constant 0 : index
    %20 = vector.load %arg5[%c0_13, %c0_14] : memref<32x4xf32, #tpu.memory_space<vmem>>, vector<32x4xf32>
    %cst_15 = arith.constant dense<0.000000e+00> : vector<4x4xf32>
    %21 = tpu.matmul %19, %20, %cst_15 {dimension_numbers = #tpu.dot_dimension_numbers<[1], [0], [0], [1], [0, 0, 1, 1], [], []>} : vector<4x32xf32>, vector<32x4xf32>, vector<4x4xf32> -> vector<4x4xf32>
    %cst_16 = arith.constant 1.250000e-01 : f32
    %22 = vector.broadcast %cst_16 : f32 to vector<4x4xf32>
    %23 = arith.mulf %21, %22 : vector<4x4xf32>
    %24 = vector.extract_strided_slice %23 {offsets = [0, 0], sizes = [2, 4], strides = [1, 1]} : vector<4x4xf32> to vector<2x4xf32>
    %25 = vector.extract_strided_slice %23 {offsets = [2, 0], sizes = [2, 4], strides = [1, 1]} : vector<4x4xf32> to vector<2x4xf32>
    %26 = arith.mulf %24, %24 : vector<2x4xf32>
    %27 = arith.subf %25, %26 : vector<2x4xf32>
    %28 = tpu.concatenate %24, %27 in 0 : vector<2x4xf32>, vector<2x4xf32> -> vector<4x4xf32>
    %c0_17 = arith.constant 0 : index
    %c0_18 = arith.constant 0 : index
    %29 = vector.load %arg6[%c0_17, %c0_18] : memref<4x32xf32, #tpu.memory_space<vmem>>, vector<4x32xf32>
    %cst_19 = arith.constant dense<0.000000e+00> : vector<4x32xf32>
    %30 = tpu.matmul %28, %29, %cst_19 {dimension_numbers = #tpu.dot_dimension_numbers<[1], [0], [0], [1], [0, 0, 1, 1], [], []>} : vector<4x4xf32>, vector<4x32xf32>, vector<4x32xf32> -> vector<4x32xf32>
    %31 = vector.extract_strided_slice %30 {offsets = [0, 0], sizes = [2, 32], strides = [1, 1]} : vector<4x32xf32> to vector<2x32xf32>
    %32 = arith.subf %17, %31 : vector<2x32xf32>
    %33 = vector.extract_strided_slice %30 {offsets = [2, 0], sizes = [2, 32], strides = [1, 1]} : vector<4x32xf32> to vector<2x32xf32>
    %cst_20 = arith.constant 9.99999974E-6 : f32
    %34 = vector.broadcast %cst_20 : f32 to vector<2x32xf32>
    %35 = arith.addf %33, %34 : vector<2x32xf32>
    %36 = math.rsqrt %35 : vector<2x32xf32>
    %37 = arith.mulf %32, %36 : vector<2x32xf32>
    %c0_21 = arith.constant 0 : index
    %c0_22 = arith.constant 0 : index
    %38 = vector.load %arg7[%c0_21, %c0_22] : memref<1x32xf32, #tpu.memory_space<vmem>>, vector<1x32xf32>
    %39 = vector.broadcast %38 : vector<1x32xf32> to vector<2x32xf32>
    %40 = arith.mulf %37, %39 : vector<2x32xf32>
    %c0_23 = arith.constant 0 : index
    %c0_24 = arith.constant 0 : index
    %41 = vector.load %arg8[%c0_23, %c0_24] : memref<1x32xf32, #tpu.memory_space<vmem>>, vector<1x32xf32>
    %42 = vector.broadcast %41 : vector<1x32xf32> to vector<2x32xf32>
    %43 = arith.addf %40, %42 : vector<2x32xf32>
    %44 = arith.addf %12, %43 : vector<2x32xf32>
    %cst_25 = arith.constant 0.000000e+00 : f32
    %45 = vector.broadcast %cst_25 : f32 to vector<2x32xf32>
    %46 = arith.maximumf %44, %45 : vector<2x32xf32>
    %c0_26 = arith.constant 0 : index
    %c0_27 = arith.constant 0 : index
    %47 = vector.load %arg9[%c0_26, %c0_27] : memref<2x32xf32, #tpu.memory_space<vmem>>, vector<2x32xf32>
    tpu.vector_store %arg9[%c0_26, %c0_27], %46 {strides = array<i32>} : memref<2x32xf32, #tpu.memory_space<vmem>>, vector<2x32xf32>,
    return
  }
}

</mosaic_0001>

<bundles_post_ra>
// kernel: symmetric_child_diff_encoder.1
= control target key start
LH: loop header
LB: loop body
LE: loop exit
PB: predicated region body
PF: predicated region fallthrough
CT: control target
= control target key end

     0   :  { %s460_s0 = inlined_call_operand.vmem [shape: f32[2,8,128], index: 0, kind: input, shape index: {}]   ;;  %s461_s1 = inlined_call_operand.vmem [shape: f32[128,64], index: 1, kind: input, shape index: {}]   ;;  %s462_s2 = inlined_call_operand.vmem [shape: f32[1,64], index: 2, kind: input, shape index: {}]   ;;  %s463_s3 = inlined_call_operand.vmem [shape: f32[32,32], index: 3, kind: input, shape index: {}]   ;;  %s464_s4 = inlined_call_operand.vmem [shape: f32[1,32], index: 4, kind: input, shape index: {}]   ;;  %s465_s5 = inlined_call_operand.vmem [shape: f32[32,4], index: 5, kind: input, shape index: {}]   ;;  %s466_s6 = inlined_call_operand.vmem [shape: f32[4,32], index: 6, kind: input, shape index: {}]   ;;  %s467_s7 = inlined_call_operand.vmem [shape: f32[1,32], index: 7, kind: input, shape index: {}]   ;;  %s468_s8 = inlined_call_operand.vmem [shape: f32[1,32], index: 8, kind: input, shape index: {}]   ;;  %s469_s9 = inlined_call_operand.hbm [shape: f32[2,32], index: 9, kind: output, shape index: {}]  }
   0x1   :  { %v48_v0 = vld [vmem:[%s461_s1 + $0x78] sm:$0xff]  ;;  %v47_v1 = vld [vmem:[%s461_s1 + $0x70] sm:$0xff]  ;;  %v46_v2 = vld [vmem:[%s461_s1 + $0x68] sm:$0xff] }
   0x2   :  { %52 = vmatpush.msra.mxu0 %v48_v0  ;;  %v45_v3 = vld [vmem:[%s461_s1 + $0x60] sm:$0xff]  ;;  %v44_v4 = vld [vmem:[%s461_s1 + $0x58] sm:$0xff] }
   0x4   :  { %53 = vmatpush.msra.mxu0 %v47_v1 }
   0x6   :  { %54 = vmatpush.msra.mxu0 %v46_v2 }
   0x8   :  { %55 = vmatpush.msra.mxu0 %v45_v3 }
   0x9   :  { %14 = vsyncpa [#allocation3], 0  ;;  %v43_v5 = vld [vmem:[%s461_s1 + $0x50] sm:$0xff]  ;;  %v42_v6 = vld [vmem:[%s461_s1 + $0x48] sm:$0xff]  ;;  %vm75_vm0 = vcmask 523264   ;;  %vm108_vm1 = vcmask 1041409  }
   0xa   :  { %56 = vmatpush.msra.mxu0 %v44_v4  ;;  %v41_v7 = vld [vmem:[%s461_s1 + $0x40] sm:$0xff]  ;;  %v40_v8 = vld [vmem:[%s461_s1 + $0x38] sm:$0xff]  ;;  %v39_v9 = vld [vmem:[%s461_s1 + $0x30] sm:$0xff]  ;;  %vm110_vm2 = vcmask 261120   ;;  %vm137_vm3 = vcmask 1041408   ;;  %vm178_vm4 = vcmask 1043456  }
   0xb   :  { %v38_v10 = vld [vmem:[%s461_s1 + $0x28] sm:$0xff]  ;;  %v37_v11 = vld [vmem:[%s461_s1 + $0x20] sm:$0xff]  ;;  %v36_v12 = vld [vmem:[%s461_s1 + $0x18] sm:$0xff]  ;;  %vm174_vm5 = vcmask 31744   ;;  %s304_s22 = smov 32   ;;  %s306_s23 = smov [#allocation2]  }
   0xc   :  { %57 = vmatpush.msra.mxu0 %v43_v5  ;;  %v35_v13 = vld [vmem:[%s461_s1 + $0x10] sm:$0xff]  ;;  %v34_v14 = vld [vmem:[%s461_s1 + $0x8] sm:$0xff]  ;;  %v33_v15 = vld [vmem:[%s461_s1] sm:$0xff]  ;;  %s254_s24 = sshll.u32 %s306_s23, 4  ;;  %s256_s26 = sshll.u32 %s469_s9, 4  ;;  %vm247_vm9 = vcmask 254976   ;;  %s255_s24 = int_to_ptr.vmem [resolvable:$true] %s254_s24  ;;  %s257_s26 = int_to_ptr.hbm [resolvable:$true] %s256_s26 }
   0xd   :  { %v50_v16 = vld [vmem:[%s460_s0] sm:$0xff]  ;;  %v51_v17 = vld [vmem:[%s460_s0 + $0x8] sm:$0xff]  ;;  %v100_v18 = vld [vmem:[%s463_s3 + $0x18] sm:$0xff] }
   0xe   :  { %58 = vmatpush.msra.mxu0 %v42_v6  ;;  %125 = vmatpush.msra.mxu1 %v100_v18  ;;  %v99_v19 = vld [vmem:[%s463_s3 + $0x10] sm:$0xff]  ;;  %v98_v20 = vld [vmem:[%s463_s3 + $0x8] sm:$0xff]  ;;  %v97_v21 = vld [vmem:[%s463_s3] sm:$0xff] }
   0xf   :  { %v272_v37 = vld [vmem:[%s462_s2] ss:$0 sm:$0xff]  ;;  %v142_v45 = vld [vmem:[%s465_s5 + $0x18] sm:$0xff]  ;;  %v141_v46 = vld [vmem:[%s465_s5 + $0x10] sm:$0xff] }
  0x10   :  { %59 = vmatpush.msra.mxu0 %v41_v7  ;;  %126 = vmatpush.msra.mxu1 %v99_v19  ;;  %v140_v47 = vld [vmem:[%s465_s5 + $0x8] sm:$0xff]  ;;  %v139_v48 = vld [vmem:[%s465_s5] sm:$0xff] }
  0x11   :  { %158 = vmatpush.msra.mxu2 %v142_v45  ;;  %v273_v49 = vld [vmem:[%s464_s4] ss:$0 sm:$0xff] }
  0x12   :  { %60 = vmatpush.msra.mxu0 %v40_v8  ;;  %127 = vmatpush.msra.mxu1 %v98_v20  ;;  %v173_v55 = vld [vmem:[%s466_s6] sm:$0xf] }
  0x13   :  { %159 = vmatpush.msra.mxu2 %v141_v46  ;;  %267 = vmatpush.msk.msra.mxu3 %vm178_vm4, %v173_v55 }
  0x14   :  { %61 = vmatpush.msra.mxu0 %v39_v9  ;;  %128 = vmatpush.msra.mxu1 %v97_v21  ;;  %v274_v9 = vld [vmem:[%s467_s7] ss:$0 sm:$0xff]  ;;  %s305_s7 = smov 96  }
  0x15   :  { %160 = vmatpush.msra.mxu2 %v140_v47 }
  0x16   :  { %62 = vmatpush.msra.mxu0 %v38_v10 }
  0x17   :  { %161 = vmatpush.msra.mxu2 %v139_v48 }
  0x18   :  { %63 = vmatpush.msra.mxu0 %v37_v11  ;;  %v275_v11 = vld [vmem:[%s468_s8] ss:$0 sm:$0xff] }
  0x1a   :  { %64 = vmatpush.msra.mxu0 %v36_v12 }
  0x1c   :  { %65 = vmatpush.msra.mxu0 %v35_v13 }
  0x1e   :  { %66 = vmatpush.msra.mxu0 %v34_v14 }
  0x20   :  { %67 = vmatpush.msra.mxu0 %v33_v15 }
  0x21   :  { %68 = vmatmul.f32.vlgmr.msra.gmra.mxu0 %v50_v16 }
  0x29   :  { %71 = vmatmul.f32.gmra.mxu0 %v51_v17 }
  0x9e   :  { %v69_v22 = vpop.f32.mrf.mxu0 }
  0x9f   :  { %v76_v23 = vsel %vm75_vm0, %v69_v22, -inf }
  0xa0   :  { %v77_v24 = vrot.slane %v76_v23, 4 }
  0xa2   :  { %v78_v25 = vmax.f32 %v76_v23, %v77_v24 }
  0xa4   :  { %v79_v26 = vrot.slane %v78_v25, 2 }
  0xa6   :  { %v72_v27 = vpop.f32.mrf.mxu0  ;;  %v80_v29 = vmax.f32 %v78_v25, %v79_v26 }
  0xa7   :  { %v83_v28 = vsel %vm75_vm0, %v72_v27, -inf }
  0xa8   :  { %v84_v30 = vrot.slane %v83_v28, 4  ;;  %v81_v32 = vrot.slane %v80_v29, 1 }
  0xaa   :  { %v85_v31 = vmax.f32 %v83_v28, %v84_v30  ;;  %v82_v35 = vmax.f32 %v80_v29, %v81_v32 }
  0xac   :  { %v86_v33 = vrot.slane %v85_v31, 2  ;;  %v426_v40 = vadd.f32 %v272_v37, %v82_v35 }
  0xae   :  { %v87_v34 = vmax.f32 %v85_v31, %v86_v33  ;;  %v95_v42 = vmax.f32 %v426_v40, 0.0 }
  0xb0   :  { %v88_v36 = vrot.slane %v87_v34, 1 }
  0xb2   :  { %v89_v38 = vmax.f32 %v87_v34, %v88_v36 }
  0xb4   :  { %v94_v39 = vadd.f32 %v272_v37, %v89_v38 }
  0xb6   :  { %v96_v41 = vmax.f32 %v94_v39, 0.0 }
  0xb8   :  { %v107_v43 = vrot.slane %v96_v41, 7 }
  0xba   :  { %v109_v44 = vsel %vm108_vm1, %v107_v43, %v95_v42 }
  0xbb   :  { %265 = vmatmul.msk.f32.vlgmr.msra.gmra.mxu1 %vm110_vm2, %v109_v44 }
 0x138   :  { %v130_v50 = vpop.f32.mrf.mxu1 }
 0x139   :  { %v131_v51 = vadd.f32 %v273_v49, %v130_v50 }
 0x13b   :  { %v133_v52 = vmul.f32 %v131_v51, %v131_v51 }
 0x13d   :  { %v135_v53 = vrot.slane %v133_v52, 6 }
 0x13f   :  { %v138_v54 = vsel %vm137_vm3, %v131_v51, %v135_v53 }
 0x140   :  { %266 = vmatmul.msk.f32.vlgmr.msra.gmra.mxu2 %vm110_vm2, %v138_v54 }
 0x1c3   :  { %v163_v56 = vpop.f32.mrf.mxu2 }
 0x1c4   :  { %v166_v57 = vmul.f32 0.125, %v163_v56 }
 0x1c6   :  { %v167_v58 = vmul.f32 %v166_v57, %v166_v57 }
 0x1c8   :  { %v169_v59 = vrot.slane %v167_v58, 6 }
 0x1ca   :  { %v171_v60 = vsub.f32 %v166_v57, %v169_v59 }
 0x1cc   :  { %v172_v61 = vsel %vm137_vm3, %v166_v57, %v171_v60 }
 0x1cd   :  { %268 = vmatmul.msk.f32.vlgmr.msra.gmra.mxu3 %vm174_vm5, %v172_v61 }
 0x250   :  { %v199_v62 = vpop.f32.mrf.mxu3 }
 0x251   :  { %v203_v63 = vadd.f32 1e-05, %v199_v62  ;;  %v202_v7 = vsub.f32 %v131_v51, %v199_v62 }
 0x253   :  { %276 = vrsqrt.f32 %v203_v63  ;;  %vm210_vm7 = vweird.f32 %v203_v63 }
 0x259   :  { %v277_v0 = vpop.eup %276 }
 0x25a   :  { %v205_v1 = vmul.f32 %v277_v0, %v203_v63  ;;  %vm211_vm6 = vweird.f32 %v277_v0 }
 0x25b   :  { %vm212_vm8 = vmor %vm210_vm7, %vm211_vm6 }
 0x25c   :  { %v206_v2 = vmul.f32 %v277_v0, %v205_v1 }
 0x25e   :  { %v207_v3 = vmul.f32 0.5, %v206_v2 }
 0x260   :  { %v208_v4 = vsub.f32 1.5, %v207_v3 }
 0x262   :  { %v209_v5 = vmul.f32 %v277_v0, %v208_v4 }
 0x264   :  { %v213_v6 = vsel %vm212_vm8, %v277_v0, %v209_v5 }
 0x265   :  { %v215_v8 = vrot.slane %v213_v6, 2 }
 0x267   :  { %v217_v10 = vmul.f32 %v215_v8, %v202_v7 }
 0x269   :  { %v222_v12 = vmul.f32 %v274_v9, %v217_v10 }
 0x26b   :  { %v227_v13 = vadd.f32 %v275_v11, %v222_v12 }
 0x26d   :  { %v229_v14 = vrot.slane %v227_v13, 1 }
 0x26f   :  { %232 = vrot.lane.b32.xlu0 %v229_v14, %s304_s22 }
 0x277   :  { %230 = vrot.lane.b32.xlu0 %v227_v13, %s304_s22 }
 0x2e1   :  { %v233_v15 = vpop.permute.xlu0 %232 }
 0x2e2   :  { %v237_v16 = vadd.f32 %v233_v15, %v96_v41 }
 0x2e4   :  { %v239_v17 = vmax.f32 %v237_v16, 0.0 }
 0x2e6   :  { %v242_v20 = vrot.slane %v239_v17, 7 }
 0x2e9   :  { %v231_v18 = vpop.permute.xlu0 %230 }
 0x2ea   :  { %v236_v19 = vadd.f32 %v231_v18, %v95_v42 }
 0x2ec   :  { %v238_v21 = vmax.f32 %v236_v19, 0.0 }
 0x2ee   :  { %v243_v22 = vsel %vm108_vm1, %v242_v20, %v238_v21 }
 0x2ef   :  { %244 = vrot.lane.b32.xlu1 %v243_v22, %s305_s7 }
 0x361   :  { %v245_v23 = vpop.permute.xlu1 %244 }
 0x362   :  { %248 = vst.msk [vmem:[#allocation2] sm:$0x3] %vm247_vm9, %v245_v23 }
 0x363   :  { %259 = dma.vmem_to_hbm [thread:$0]  %s255_s24, 32, %s257_s26, [#allocation3]  }
 0x364   :  { %302 = dma.done.wait [#allocation3], 32  }
 0x365   :  { %303 = vsyncadd [#allocation3], 4294967264 }
 0x366   :  { %264 = vsyncpa [#allocation3], 1 }

</bundles_post_ra>
